<compile_context>
chip_gen: v7x
topology: tpu7x:2x2x1
jax: 0.10.0
libtpu: 0.0.40
codegen_flags: <defaults>
</compile_context>

<pallas_src>
import functools

import jax
import jax.numpy as jnp
import numpy as np
from jax import lax
from jax.experimental import pallas as pl
from jax.experimental.pallas import tpu as pltpu


def _round_up(x, m):
    return (x + m - 1) // m * m


def _conv_bn_silu_kernel(x_ref, w_ref, b_ref, o_ref, *, K, W, p, L_out):
    """One batch element per grid step.

    x_ref : (1, Cin_pad, L_in)   height-padded image, flattened row-major with
                                 row stride W, prepended with p zero columns
                                 and zero-padded to L_in lanes
    w_ref : (Cout, K*K*Cin_pad)  BN-scale-folded weights, tap-major ordering
    b_ref : (Cout, 1)            folded BN bias
    o_ref : (1, Cout, L_out)     lane-dense output (channel-major / NCHW-flat)
    """
    xb = x_ref[0]                                     # (Cin_pad, L_in)
    cin_pad = xb.shape[0]

    # Output-width coordinate of each lane: w = q % W  (q = h*W + w).
    lane_w = lax.broadcasted_iota(jnp.int32, (cin_pad, L_out), 1) % W

    # One boolean mask per distinct horizontal tap offset (kw - p != 0): the
    # flat shift wraps across rows at the width boundary, so those lanes must
    # contribute zero (they correspond to the width padding).
    offs = sorted({kw - p for kw in range(K) if kw != p})
    masks = {off: jnp.logical_and(lane_w + off >= 0, lane_w + off < W)
             for off in offs}

    # im2col via static lane shifts: tap (kh, kw) is input column q + kh*W + kw.
    pieces = []
    for kh in range(K):
        for kw in range(K):
            shift = kh * W + kw
            piece = xb[:, shift:shift + L_out]        # (Cin_pad, L_out)
            off = kw - p
            if off != 0:
                piece = jnp.where(masks[off], piece, 0.0)
            pieces.append(piece)
    rhs = jnp.concatenate(pieces, axis=0)             # (K*K*Cin_pad, L_out)

    # Single deep matmul on the MXU, f32 accumulation.
    acc = jnp.dot(w_ref[...], rhs,
                  preferred_element_type=jnp.float32)  # (Cout, L_out)

    # Folded-BN bias + SiLU on dense f32 vregs, one full-width unmasked store.
    y = acc + b_ref[...]
    y = y * jax.nn.sigmoid(y)
    o_ref[0] = y.astype(o_ref.dtype)


@functools.partial(jax.jit, static_argnames=("stride", "eps"))
def conv_bn_silu(x_nchw, weight_oihw, gamma, beta, running_mean, running_var,
                 *, stride=1, eps=1e-3):
    """Forward pass of Conv: SiLU(BN(Conv2d(x)))  (inference-mode BN).

    x_nchw      : (N, Cin, H, W)     float32
    weight_oihw : (Cout, Cin, K, K)  float32  (groups=1, dilation=1, no bias)
    returns     : (N, Cout, H, W)    NCHW, matching PyTorch (stride 1, SAME pad)
    """
    assert stride == 1, "this synthetic instance uses s=1"
    N, Cin, H, W = x_nchw.shape
    Cout, Cin_w, K, _ = weight_oihw.shape
    assert Cin_w == Cin
    p = K // 2                          # pad(k) with p=None, d=1  ->  k // 2
    Hp = H + 2 * p

    cin_pad = _round_up(Cin, 8)                     # f32 sublane tile
    HW = H * W
    L_out = _round_up(HW, 128)                      # lane-dense matmul width
    s_max = (K - 1) * W + (K - 1)                   # largest tap shift
    L_in = _round_up(max(s_max + L_out, p + Hp * W), 128)

    # ---- glue (no transposes of the activation): channel-pad + HEIGHT-only
    # ---- spatial pad + row-major flatten + prepend p zeros + lane-pad.
    x_p = jnp.pad(x_nchw.astype(jnp.float32),
                  ((0, 0), (0, cin_pad - Cin), (p, p), (0, 0)))
    x_flat = x_p.reshape(N, cin_pad, Hp * W)
    x_flat = jnp.pad(x_flat, ((0, 0), (0, 0), (p, L_in - Hp * W - p)))

    # ---- fold BN (inference) into the weights + a per-channel bias.
    scale = (gamma / jnp.sqrt(running_var + eps)).astype(jnp.float32)   # (Cout,)
    bias = (beta - running_mean * scale).reshape(Cout, 1).astype(jnp.float32)
    w4 = jnp.transpose(weight_oihw.astype(jnp.float32), (0, 2, 3, 1))   # (Cout,K,K,Cin)
    w4 = jnp.pad(w4, ((0, 0), (0, 0), (0, 0), (0, cin_pad - Cin)))
    w2 = (w4 * scale[:, None, None, None]).reshape(Cout, K * K * cin_pad)

    kernel = functools.partial(_conv_bn_silu_kernel,
                               K=K, W=W, p=p, L_out=L_out)

    out_flat = pl.pallas_call(
        kernel,
        out_shape=jax.ShapeDtypeStruct((N, Cout, L_out), jnp.float32),
        grid_spec=pltpu.PrefetchScalarGridSpec(
            num_scalar_prefetch=0,
            grid=(N,),
            in_specs=[
                pl.BlockSpec((1, cin_pad, L_in), lambda n: (n, 0, 0)),
                pl.BlockSpec((Cout, K * K * cin_pad), lambda n: (0, 0)),
                pl.BlockSpec((Cout, 1), lambda n: (0, 0)),
            ],
            out_specs=pl.BlockSpec((1, Cout, L_out), lambda n: (n, 0, 0)),
        ),
        compiler_params=pltpu.CompilerParams(
            dimension_semantics=("parallel",)),
    )(x_flat, w2, bias)

    # Drop lane padding (no-op when H*W is already a multiple of 128) and
    # reshape (metadata-only) to NCHW, matching PyTorch.
    return out_flat[:, :, :HW].reshape(N, Cout, H, W)


def _reference(x_nchw, weight_oihw, gamma, beta, running_mean, running_var,
               *, eps=1e-3):
    y = lax.conv_general_dilated(
        x_nchw, weight_oihw, window_strides=(1, 1), padding="SAME",
        dimension_numbers=("NCHW", "OIHW", "NCHW"))
    s = (gamma / jnp.sqrt(running_var + eps)).reshape(1, -1, 1, 1)
    b = (beta - running_mean * gamma / jnp.sqrt(running_var + eps)).reshape(1, -1, 1, 1)
    y = y * s + b
    return y * jax.nn.sigmoid(y)


if __name__ == "__main__":
    # Module config: Conv(in_ch=4, out_ch=8, k=3, s=1)  ->  pad=1, d=1, g=1
    N, Cin, H, W = 2, 4, 16, 16
    Cout, K = 8, 3

    key = jax.random.PRNGKey(0)
    kx, kw, kg, kb, km, kv = jax.random.split(key, 6)

    x = jax.random.normal(kx, (N, Cin, H, W), dtype=jnp.float32)
    # Conv2d weight (no bias), deterministic init
    weight = jax.random.normal(kw, (Cout, Cin, K, K), dtype=jnp.float32) * 0.1
    # BatchNorm2d(out_ch, eps=0.001) parameters / running stats (inference)
    gamma = 1.0 + 0.1 * jax.random.normal(kg, (Cout,), dtype=jnp.float32)
    beta = 0.1 * jax.random.normal(kb, (Cout,), dtype=jnp.float32)
    running_mean = 0.1 * jax.random.normal(km, (Cout,), dtype=jnp.float32)
    running_var = 1.0 + 0.5 * jax.random.uniform(kv, (Cout,), dtype=jnp.float32)

    out = conv_bn_silu(x, weight, gamma, beta, running_mean, running_var)
    out = jax.block_until_ready(out)

    ref = _reference(x, weight, gamma, beta, running_mean, running_var)
    np.testing.assert_allclose(np.asarray(out), np.asarray(ref),
                               rtol=1e-4, atol=1e-4)
    print("KERNEL_OK")
</pallas_src>

<mosaic_0001>
module attributes {stable_mosaic.version = 11 : i64} {
  func.func @_conv_bn_silu_kernel(%arg0: i32, %arg1: memref<1x8x384xf32, #tpu.memory_space<vmem>>, %arg2: memref<8x72xf32, #tpu.memory_space<vmem>>, %arg3: memref<8x1xf32, #tpu.memory_space<vmem>>, %arg4: memref<1x8x256xf32, #tpu.memory_space<vmem>>) attributes {dimension_semantics = [#tpu.dimension_semantics<parallel>], iteration_bounds = array<i64: 2>, scalar_prefetch = 0 : i64, scratch_operands = 0 : i64, tpu.core_type = #tpu.core_type<tc>, window_params = [{transform_indices = @transform_0, window_bounds = array<i64: 1, 8, 384>}, {pipeline_mode = #tpu.pipeline_mode<synchronous>, transform_indices = @transform_1, window_bounds = array<i64: 8, 72>}, {pipeline_mode = #tpu.pipeline_mode<synchronous>, transform_indices = @transform_2, window_bounds = array<i64: 8, 1>}, {transform_indices = @transform_3, window_bounds = array<i64: 1, 8, 256>}]} {
    %c0 = arith.constant 0 : index
    %c0_0 = arith.constant 0 : index
    %c0_1 = arith.constant 0 : index
    %0 = vector.load %arg1[%c0, %c0_0, %c0_1] : memref<1x8x384xf32, #tpu.memory_space<vmem>>, vector<1x8x384xf32>
    %1 = vector.shape_cast %0 : vector<1x8x384xf32> to vector<8x384xf32>
    %2 = tpu.iota {dimensions = array<i32: 1>} : vector<8x256xi32>
    %c16_i32 = arith.constant 16 : i32
    %c0_i32 = arith.constant 0 : i32
    %3 = arith.cmpi eq, %c16_i32, %c0_i32 : i32
    %c1_i32 = arith.constant 1 : i32
    %4 = arith.select %3, %c1_i32, %c16_i32 : i32
    %5 = vector.broadcast %4 : i32 to vector<8x256xi32>
    %6 = arith.remsi %2, %5 : vector<8x256xi32>
    %c0_i32_2 = arith.constant 0 : i32
    %7 = vector.broadcast %c0_i32_2 : i32 to vector<8x256xi32>
    %8 = arith.cmpi ne, %6, %7 : vector<8x256xi32>
    %c0_i32_3 = arith.constant 0 : i32
    %9 = vector.broadcast %c0_i32_3 : i32 to vector<8x256xi32>
    %10 = arith.cmpi slt, %6, %9 : vector<8x256xi32>
    %c0_i32_4 = arith.constant 0 : i32
    %11 = arith.cmpi slt, %4, %c0_i32_4 : i32
    %12 = vector.broadcast %11 : i1 to vector<8x256xi1>
    %13 = vector.broadcast %12 : vector<8x256xi1> to vector<8x256xi1>
    %14 = arith.xori %10, %13 : vector<8x256xi1>
    %15 = arith.andi %14, %8 : vector<8x256xi1>
    %16 = vector.broadcast %4 : i32 to vector<8x256xi32>
    %17 = arith.addi %6, %16 : vector<8x256xi32>
    %18 = arith.select %15, %17, %6 : vector<8x256xi1>, vector<8x256xi32>
    %c-1_i32 = arith.constant -1 : i32
    %19 = vector.broadcast %c-1_i32 : i32 to vector<8x256xi32>
    %20 = arith.addi %18, %19 : vector<8x256xi32>
    %c0_i32_5 = arith.constant 0 : i32
    %21 = vector.broadcast %c0_i32_5 : i32 to vector<8x256xi32>
    %22 = arith.cmpi sge, %20, %21 : vector<8x256xi32>
    %c-1_i32_6 = arith.constant -1 : i32
    %23 = vector.broadcast %c-1_i32_6 : i32 to vector<8x256xi32>
    %24 = arith.addi %18, %23 : vector<8x256xi32>
    %c16_i32_7 = arith.constant 16 : i32
    %25 = vector.broadcast %c16_i32_7 : i32 to vector<8x256xi32>
    %26 = arith.cmpi slt, %24, %25 : vector<8x256xi32>
    %27 = arith.andi %22, %26 : vector<8x256xi1>
    %c1_i32_8 = arith.constant 1 : i32
    %28 = vector.broadcast %c1_i32_8 : i32 to vector<8x256xi32>
    %29 = arith.addi %18, %28 : vector<8x256xi32>
    %c0_i32_9 = arith.constant 0 : i32
    %30 = vector.broadcast %c0_i32_9 : i32 to vector<8x256xi32>
    %31 = arith.cmpi sge, %29, %30 : vector<8x256xi32>
    %c1_i32_10 = arith.constant 1 : i32
    %32 = vector.broadcast %c1_i32_10 : i32 to vector<8x256xi32>
    %33 = arith.addi %18, %32 : vector<8x256xi32>
    %c16_i32_11 = arith.constant 16 : i32
    %34 = vector.broadcast %c16_i32_11 : i32 to vector<8x256xi32>
    %35 = arith.cmpi slt, %33, %34 : vector<8x256xi32>
    %36 = arith.andi %31, %35 : vector<8x256xi1>
    %37 = vector.extract_strided_slice %1 {offsets = [0, 0], sizes = [8, 256], strides = [1, 1]} : vector<8x384xf32> to vector<8x256xf32>
    %cst = arith.constant 0.000000e+00 : f32
    %38 = vector.broadcast %cst : f32 to vector<8x256xf32>
    %39 = arith.select %27, %37, %38 : vector<8x256xi1>, vector<8x256xf32>
    %40 = vector.extract_strided_slice %1 {offsets = [0, 1], sizes = [8, 256], strides = [1, 1]} : vector<8x384xf32> to vector<8x256xf32>
    %41 = vector.extract_strided_slice %1 {offsets = [0, 2], sizes = [8, 256], strides = [1, 1]} : vector<8x384xf32> to vector<8x256xf32>
    %cst_12 = arith.constant 0.000000e+00 : f32
    %42 = vector.broadcast %cst_12 : f32 to vector<8x256xf32>
    %43 = arith.select %36, %41, %42 : vector<8x256xi1>, vector<8x256xf32>
    %44 = vector.extract_strided_slice %1 {offsets = [0, 16], sizes = [8, 256], strides = [1, 1]} : vector<8x384xf32> to vector<8x256xf32>
    %cst_13 = arith.constant 0.000000e+00 : f32
    %45 = vector.broadcast %cst_13 : f32 to vector<8x256xf32>
    %46 = arith.select %27, %44, %45 : vector<8x256xi1>, vector<8x256xf32>
    %47 = vector.extract_strided_slice %1 {offsets = [0, 17], sizes = [8, 256], strides = [1, 1]} : vector<8x384xf32> to vector<8x256xf32>
    %48 = vector.extract_strided_slice %1 {offsets = [0, 18], sizes = [8, 256], strides = [1, 1]} : vector<8x384xf32> to vector<8x256xf32>
    %cst_14 = arith.constant 0.000000e+00 : f32
    %49 = vector.broadcast %cst_14 : f32 to vector<8x256xf32>
    %50 = arith.select %36, %48, %49 : vector<8x256xi1>, vector<8x256xf32>
    %51 = vector.extract_strided_slice %1 {offsets = [0, 32], sizes = [8, 256], strides = [1, 1]} : vector<8x384xf32> to vector<8x256xf32>
    %cst_15 = arith.constant 0.000000e+00 : f32
    %52 = vector.broadcast %cst_15 : f32 to vector<8x256xf32>
    %53 = arith.select %27, %51, %52 : vector<8x256xi1>, vector<8x256xf32>
    %54 = vector.extract_strided_slice %1 {offsets = [0, 33], sizes = [8, 256], strides = [1, 1]} : vector<8x384xf32> to vector<8x256xf32>
    %55 = vector.extract_strided_slice %1 {offsets = [0, 34], sizes = [8, 256], strides = [1, 1]} : vector<8x384xf32> to vector<8x256xf32>
    %cst_16 = arith.constant 0.000000e+00 : f32
    %56 = vector.broadcast %cst_16 : f32 to vector<8x256xf32>
    %57 = arith.select %36, %55, %56 : vector<8x256xi1>, vector<8x256xf32>
    %58 = tpu.concatenate %39, %40, %43, %46, %47, %50, %53, %54, %57 in 0 : vector<8x256xf32>, vector<8x256xf32>, vector<8x256xf32>, vector<8x256xf32>, vector<8x256xf32>, vector<8x256xf32>, vector<8x256xf32>, vector<8x256xf32>, vector<8x256xf32> -> vector<72x256xf32>
    %c0_17 = arith.constant 0 : index
    %c0_18 = arith.constant 0 : index
    %59 = vector.load %arg2[%c0_17, %c0_18] : memref<8x72xf32, #tpu.memory_space<vmem>>, vector<8x72xf32>
    %cst_19 = arith.constant dense<0.000000e+00> : vector<8x256xf32>
    %60 = tpu.matmul %59, %58, %cst_19 {dimension_numbers = #tpu.dot_dimension_numbers<[1], [0], [0], [1], [0, 0, 1, 1], [], []>} : vector<8x72xf32>, vector<72x256xf32>, vector<8x256xf32> -> vector<8x256xf32>
    %c0_20 = arith.constant 0 : index
    %c0_21 = arith.constant 0 : index
    %61 = vector.load %arg3[%c0_20, %c0_21] : memref<8x1xf32, #tpu.memory_space<vmem>>, vector<8x1xf32>
    %62 = vector.broadcast %61 : vector<8x1xf32> to vector<8x256xf32>
    %63 = arith.addf %60, %62 : vector<8x256xf32>
    %64 = arith.negf %63 : vector<8x256xf32>
    %65 = math.exp %64 : vector<8x256xf32>
    %cst_22 = arith.constant 1.000000e+00 : f32
    %66 = vector.broadcast %cst_22 : f32 to vector<8x256xf32>
    %67 = arith.addf %66, %65 : vector<8x256xf32>
    %68 = arith.divf %66, %67 : vector<8x256xf32>
    %69 = arith.mulf %63, %68 : vector<8x256xf32>
    %c0_23 = arith.constant 0 : index
    %c0_24 = arith.constant 0 : index
    %c0_25 = arith.constant 0 : index
    %70 = vector.load %arg4[%c0_23, %c0_24, %c0_25] : memref<1x8x256xf32, #tpu.memory_space<vmem>>, vector<1x8x256xf32>
    %71 = vector.shape_cast %70 : vector<1x8x256xf32> to vector<8x256xf32>
    %72 = vector.shape_cast %69 : vector<8x256xf32> to vector<1x8x256xf32>
    tpu.vector_store %arg4[%c0_23, %c0_24, %c0_25], %72 {strides = array<i32>} : memref<1x8x256xf32, #tpu.memory_space<vmem>>, vector<1x8x256xf32>,
    return
  }
  func.func @transform_0(%arg0: i32) -> (i32, i32, i32) {
    %c0_i32 = arith.constant 0 : i32
    %c0_i32_0 = arith.constant 0 : i32
    %c0_i32_1 = arith.constant 0 : i32
    return %arg0, %c0_i32, %c0_i32_0 : i32, i32, i32
  }
  func.func @transform_1(%arg0: i32) -> (i32, i32) {
    %c0_i32 = arith.constant 0 : i32
    %c0_i32_0 = arith.constant 0 : i32
    %c0_i32_1 = arith.constant 0 : i32
    return %c0_i32, %c0_i32_0 : i32, i32
  }
  func.func @transform_2(%arg0: i32) -> (i32, i32) {
    %c0_i32 = arith.constant 0 : i32
    %c0_i32_0 = arith.constant 0 : i32
    %c0_i32_1 = arith.constant 0 : i32
    return %c0_i32, %c0_i32_0 : i32, i32
  }
  func.func @transform_3(%arg0: i32) -> (i32, i32, i32) {
    %c0_i32 = arith.constant 0 : i32
    %c0_i32_0 = arith.constant 0 : i32
    %c0_i32_1 = arith.constant 0 : i32
    return %arg0, %c0_i32, %c0_i32_0 : i32, i32, i32
  }
}

</mosaic_0001>

<bundles_post_ra>
// kernel: conv_bn_silu.1
= control target key start
LH: loop header
LB: loop body
LE: loop exit
PB: predicated region body
PF: predicated region fallthrough
CT: control target
= control target key end

     0   :  { %s627_s12 = smov 0   ;;  %s718_s0 = inlined_call_operand.vmem [shape: f32[2,8,384], index: 0, kind: input, shape index: {}]   ;;  %s719_s1 = inlined_call_operand.vmem [shape: f32[8,72], index: 1, kind: input, shape index: {}]   ;;  %s720_s2 = inlined_call_operand.vmem [shape: f32[8,1], index: 2, kind: input, shape index: {}]   ;;  %s721_s3 = inlined_call_operand.vmem [shape: f32[2,8,256], index: 3, kind: output, shape index: {}]  }
   0x1 LB: > { %s473_s13 = sadd.s32 4294967295, %s594_s12   ;;  %p477_p0 = scmp.ge.s32.totalorder %s594_s12, 1  ;;  %s594_s12 = sphi %s627_s12, %s13_s12  }
   0x2   : > { %p137_p1 = scmp.lt.s32.totalorder %s594_s12, 3 }
   0x4   : > { %p138_p2 = pnand %p477_p0, %p137_p1 }
   0x5   : > { %p161_p3 = scmp.lt.s32.totalorder (!%p138_p2), %s473_s13, 1  ;;  %s596_s18 = smov (!%p138_p2), 126   ;;  %v603_v4 = vmov (!%p138_p2), 0.0   ;;  %v604_v5 = vmov (!%p138_p2), 0   ;;  %v321_v6 = vld [vmem:[%s720_s2] sm:$0xff] (!%p138_p2)  ;;  %v174_v7 = vlaneseq (!%p138_p2)  ;;  %vm293_vm0 = vcmask (!%p138_p2), 1039360  }
   0x6   : > { %141 = sbr.rel (%p138_p2) target bundleno = 413 (0x19d), region = 32  ;;  %s597_s19 = smov (!%p138_p2), 127   ;;  %395 = vmatprep.mubr.f32.mxu0 (!%p138_p2), %v603_v4  ;;  %578 = vset.pattern.permute.xlu1 (!%p138_p2), %v604_v5  ;;  %vm606_vm3 = vmmov (!%p138_p2), 1   ;;  %vm241_vm6 = vcmask (!%p138_p2), 916480   ;;  %vm228_vm7 = vcmask (!%p138_p2), 1031168   ;;  %vm304_vm12 = vcmask (!%p138_p2), 908288  }
   0x7   : > { %s598_s20 = smov (!%p138_p2), 112   ;;  %s599_s21 = smov (!%p138_p2), 111   ;;  %579 = vset.pattern.permute.xlu0 (!%p138_p2), %v604_v5  ;;  %v175_v8 = vand.u32 (!%p138_p2), 127, %v174_v7  ;;  %vm254_vm13 = vcmask (!%p138_p2), 900096  }
   0x8   : > { %s600_s22 = smov (!%p138_p2), 110   ;;  %s601_s23 = smov (!%p138_p2), 95  }
   0x9   : > { %s602_s24 = smov (!%p138_p2), 96   ;;  %s605_s25 = smov (!%p138_p2), 94   ;;  %v176_v9 = vadd.s32 (!%p138_p2), 128, %v175_v8  ;;  %v181_v11 = vand.u32 (!%p138_p2), 15, %v175_v8  ;;  %v320_v8 = vld [vmem:[%s719_s1] sm:$0xff] (!%p138_p2) }
   0xb   : > { %v188_v10 = vand.u32 (!%p138_p2), 15, %v176_v9  ;;  %v201_v13 = vadd.s32 (!%p138_p2), 4294967295, %v181_v11  ;;  %v660_v19 = vadd.s32 (!%p138_p2), 1, %v181_v11 }
   0xd   : > { %s727_s13 = smov (!%p161_p3, %s473_s13), 1  ;;  %v202_v12 = vadd.s32 4294967295, %v188_v10  ;;  %v658_v16 = vadd.s32 1, %v188_v10  ;;  %vm203_vm2 = vcmp.ge.s32.totalorder %v201_v13, 0  ;;  %vm213_vm9 = vcmp.lt.s32.totalorder %v660_v19, 16 }
   0xe   : > { %s523_s14 = smul.u32 24, %s727_s13  ;;  %vm674_vm8 = vmpackc.low %vm606_vm3, %vm203_vm2  ;;  %s498_s30 = sshll.u32 %s727_s13, 4 }
   0xf   : > { %vm204_vm1 = vcmp.ge.s32.totalorder %v202_v12, 0  ;;  %vm214_vm5 = vcmp.lt.s32.totalorder %v658_v16, 16  ;;  %vm509_vm11 = vmpackc.low %vm203_vm2, %vm213_vm9  ;;  %vm280_vm2 = vcmask 769024   ;;  %s170_s6 = scalar_lea.vmem %s721_s3, %s498_s30 }
  0x10   : > { %s165_s17 = scalar_lea.vmem %s718_s0, %s523_s14  ;;  %vm665_vm4 = vmpackc.low %vm606_vm3, %vm204_vm1 }
  0x11   : > { %v641_v0 = vld [vmem:[%s165_s17 + $0x8] sm:$0xff]  ;;  %v173_v1 = vld [vmem:[%s165_s17 + $0x10] sm:$0xff]  ;;  %v644_v3 = vld [vmem:[%s165_s17] sm:$0xff] }
  0x12   : > { %v548_v2 = vpack.i.bf16 %v173_v1, %v641_v0  ;;  %vm506_vm10 = vmpackc.low %vm204_vm1, %vm214_vm5  ;;  %vm267_vm1 = vcmask 785408  }
  0x13   : > { %vm512_vm14 = vmpackc.low %vm214_vm5, %vm606_vm3 }
  0x14   : > { %549 = vrot.lane.b32.xlu1 %v548_v2, %s596_s18  ;;  %544 = vrot.lane.b32.xlu0 %v548_v2, %s597_s19  ;;  %vm515_vm15 = vmpackc.low %vm213_vm9, %vm606_vm3  ;;  %vm327_vm3 = vcmask 588800  }
  0x18   : > { %554 = vrot.lane.b32.xlu1 %v548_v2, %s598_s20  ;;  %287 = vrot.lane.b32.xlu0 %v644_v3, %s597_s19 }
  0x1c   : > { %235 = vrot.lane.b32.xlu1 %v644_v3, %s598_s20  ;;  %222 = vrot.lane.b32.xlu0 %v644_v3, %s596_s18 }
  0x20   : > { %564 = vrot.lane.b32.xlu1 %v548_v2, %s599_s21  ;;  %559 = vrot.lane.b32.xlu0 %v548_v2, %s600_s22 }
  0x24   : > { %298 = vrot.lane.b32.xlu1 %v644_v3, %s599_s21  ;;  %248 = vrot.lane.b32.xlu0 %v644_v3, %s600_s22 }
  0x28   : > { %574 = vrot.lane.b32.xlu1 %v548_v2, %s601_s23  ;;  %569 = vrot.lane.b32.xlu0 %v548_v2, %s602_s24 }
  0x2c   : > { %309 = vrot.lane.b32.xlu1 %v644_v3, %s601_s23  ;;  %261 = vrot.lane.b32.xlu0 %v644_v3, %s602_s24 }
  0x30   : > { %278 = vrot.lane.b32.xlu1 %v173_v1, %s605_s25  ;;  %276 = vrot.lane.b32.xlu0 %v641_v0, %s605_s25 }
  0x34   : > { %274 = vrot.lane.b32.xlu0 %v644_v3, %s605_s25  ;;  %324 = vperm.xlu1 %578, %v321_v6  }
  0x86   : > { %v550_v14 = vpop.permute.xlu1 %549  ;;  %v545_v15 = vpop.permute.xlu0 %544 }
  0x87   : > { %v547_v17 = vunpack.i.h.bf16 %v545_v15  ;;  %v546_v18 = vunpack.i.l.bf16 %v545_v15  ;;  %v552_v20 = vunpack.i.h.bf16 %v550_v14  ;;  %v551_v21 = vunpack.i.l.bf16 %v550_v14 }
  0x89   : > { %v295_v22 = vsel %vm293_vm0, %v546_v18, %v547_v17  ;;  %v230_v33 = vsel %vm228_vm7, %v551_v21, %v552_v20 }
  0x8a   : > { %v555_v24 = vpop.permute.xlu1 %554  ;;  %v288_v25 = vpop.permute.xlu0 %287  ;;  %v499_v26 = vpack.c.bf16 %v295_v22, %v641_v0 }
  0x8b   : > { %v557_v27 = vunpack.i.h.bf16 %v555_v24  ;;  %v556_v28 = vunpack.i.l.bf16 %v555_v24  ;;  %v294_v29 = vsel %vm293_vm0, %v288_v25, %v546_v18  ;;  %vm315_vm0 = vcmask 777216  }
  0x8c   : > { %v502_v31 = vpack.c.bf16 %v294_v29, %v644_v3  ;;  %501 = vmatprep.subr.msk.bf16.mxu0 %vm665_vm4, %v499_v26 }
  0x8d   : > { %v243_v32 = vsel %vm241_vm6, %v556_v28, %v557_v27 }
  0x8e   : > { %v236_v34 = vpop.permute.xlu1 %235  ;;  %504 = vmatpush1.bf16.msk.msra.mxu0 %vm674_vm8, %v502_v31  ;;  %v505_v35 = vpack.c.bf16 %v243_v32, %v230_v33  ;;  %v223_v36 = vpop.permute.xlu0 %222 }
  0x8f   : > { %v242_v37 = vsel %vm241_vm6, %v236_v34, %v556_v28  ;;  %v229_v38 = vsel %vm228_vm7, %v223_v36, %v551_v21 }
  0x90   : > { %v508_v39 = vpack.c.bf16 %v242_v37, %v229_v38  ;;  %507 = vmatprep.subr.msk.bf16.mxu0 %vm506_vm10, %v505_v35 }
  0x92   : > { %v565_v40 = vpop.permute.xlu1 %564  ;;  %510 = vmatpush1.bf16.msk.msra.mxu0 %vm509_vm11, %v508_v39  ;;  %v560_v41 = vpop.permute.xlu0 %559 }
  0x93   : > { %v567_v42 = vunpack.i.h.bf16 %v565_v40  ;;  %v566_v43 = vunpack.i.l.bf16 %v565_v40  ;;  %v562_v44 = vunpack.i.h.bf16 %v560_v41  ;;  %v561_v45 = vunpack.i.l.bf16 %v560_v41 }
  0x95   : > { %v306_v46 = vsel %vm304_vm12, %v566_v43, %v567_v42  ;;  %v256_v47 = vsel %vm254_vm13, %v561_v45, %v562_v44 }
  0x96   : > { %v299_v48 = vpop.permute.xlu1 %298  ;;  %v249_v49 = vpop.permute.xlu0 %248  ;;  %v511_v50 = vpack.c.bf16 %v256_v47, %v306_v46 }
  0x97   : > { %v305_v51 = vsel %vm304_vm12, %v299_v48, %v566_v43  ;;  %v255_v52 = vsel %vm254_vm13, %v249_v49, %v561_v45 }
  0x98   : > { %v514_v53 = vpack.c.bf16 %v255_v52, %v305_v51  ;;  %513 = vmatprep.subr.msk.bf16.mxu0 %vm512_vm14, %v511_v50 }
  0x9a   : > { %v575_v54 = vpop.permute.xlu1 %574  ;;  %v570_v55 = vpop.permute.xlu0 %569  ;;  %516 = vmatpush1.bf16.msk.msra.mxu0 %vm515_vm15, %v514_v53 }
  0x9b   : > { %v577_v56 = vunpack.i.h.bf16 %v575_v54  ;;  %v576_v57 = vunpack.i.l.bf16 %v575_v54  ;;  %v572_v58 = vunpack.i.h.bf16 %v570_v55  ;;  %v571_v59 = vunpack.i.l.bf16 %v570_v55 }
  0x9d   : > { %v317_v60 = vsel %vm315_vm0, %v576_v57, %v577_v56  ;;  %v269_v61 = vsel %vm267_vm1, %v571_v59, %v572_v58 }
  0x9e   : > { %v310_v62 = vpop.permute.xlu1 %309  ;;  %v262_v63 = vpop.permute.xlu0 %261  ;;  %v517_v0 = vpack.c.bf16 %v317_v60, %v269_v61 }
  0x9f   : > { %v316_v1 = vsel %vm315_vm0, %v310_v62, %v576_v57  ;;  %v268_v2 = vsel %vm267_vm1, %v262_v63, %v571_v59 }
  0xa0   : > { %v520_v3 = vpack.c.bf16 %v316_v1, %v268_v2  ;;  %519 = vmatprep.subr.msk.bf16.mxu0 %vm665_vm4, %v517_v0 }
  0xa2   : > { %v279_v4 = vpop.permute.xlu1 %278  ;;  %v277_v5 = vpop.permute.xlu0 %276  ;;  %522 = vmatpush1.bf16.msk.msra.mxu0 %vm674_vm8, %v520_v3 }
  0xa3   : > { %v282_v6 = vsel %vm280_vm2, %v277_v5, %v279_v4 }
  0xa4   : > { %491 = vmatprep.subr.msk.mxu0 %vm214_vm5, %v282_v6 }
  0xa6   : > { %v275_v7 = vpop.permute.xlu0 %274 }
  0xa7   : > { %v281_v9 = vsel %vm280_vm2, %v275_v7, %v277_v5 }
  0xa8   : > { %492 = vmatpush1.msk.msra.mxu0 %vm213_vm9, %v281_v9 }
  0xa9   : > { %493 = vmatmul.mubr.msk.f32.vlgmr.msra.gmra.mrb[0].mxu0 %vm327_vm3, %v320_v8 }
  0xb3   : > { %v325_v10 = vpop.permute.xlu1 %324 }
 0x17c   : > { %v397_v11 = vpop.f32.mrb[0].mxu0 }
 0x17d   : > { %v398_v12 = vadd.f32 %v397_v11, %v325_v10  ;;  %v399_v13 = vpop.f32.mrb[1].mxu0 }
 0x17e   : > { %v400_v14 = vadd.f32 %v399_v13, %v325_v10 }
 0x17f   : > { %v494_v15 = vmul.f32 -1.442695, %v398_v12 }
 0x180   : > { %v495_v16 = vmul.f32 -1.442695, %v400_v14 }
 0x181   : > { %580 = vpow2.f32 %v494_v15 }
 0x182   : > { %582 = vpow2.f32 %v495_v16 }
 0x18b   : > { %v581_v17 = vpop.eup %580 }
 0x18c   : > { %v583_v18 = vpop.eup %582  ;;  %v408_v20 = vadd.f32 1.0, %v581_v17 }
 0x18d   : > { %v409_v21 = vadd.f32 1.0, %v583_v18 }
 0x18e   : > { %584 = vrcp.f32 %v408_v20 }
 0x18f   : > { %586 = vrcp.f32 %v409_v21 }
 0x198   : > { %v585_v19 = vpop.eup %584 }
 0x199   : > { %v587_v22 = vpop.eup %586  ;;  %v414_v23 = vmul.f32 %v585_v19, %v398_v12 }
 0x19a   : > { %v415_v24 = vmul.f32 %v587_v22, %v400_v14 }
 0x19b   : > { %416 = vst [vmem:[%s170_s6] sm:$0xff] %v414_v23 }
 0x19c   : > { %417 = vst [vmem:[%s170_s6 + $0x8] sm:$0xff] %v415_v24 }
 0x19d PF: > { %s13_s12 = sadd.s32 1, %s594_s12  }
 0x19e   : > { %p10_p4 = scmp.ge.s32.totalorder %s13_s12, 4  }
 0x1a0   :  { %12 = sbr.rel (!%p10_p4) target bundleno = 1 (0x1), region = 62 }

</bundles_post_ra>
